<compile_context>
chip_gen: v5e
topology: v5e:2x2
jax: 0.10.0
libtpu: 0.0.40
codegen_flags: <defaults>
</compile_context>

<pallas_src>
import functools

import jax
import jax.numpy as jnp
from jax.experimental import pallas as pl
from jax.experimental.pallas import tpu as pltpu


def _round_up(x, m):
    return ((x + m - 1) // m) * m


def _pick_tile(total, limit, granule):
    """Largest multiple of `granule` that divides `total` and is <= limit."""
    best = granule
    t = granule
    top = min(total, limit)
    while t <= top:
        if total % t == 0:
            best = t
        t += granule
    return best


def _vmem_tile_bytes(tm, tk, tn):
    """Rough per-step VMEM footprint with double-buffered inputs (bf16 x/w, f32 out)."""
    return (2 * tm * tk * 2        # x tile, bf16, double-buffered
            + 2 * tk * tn * 2      # w tile, bf16, double-buffered
            + 2 * 1 * tn * 4       # bias tile, f32
            + 2 * tm * tn * 4)     # out tile, f32


_VMEM_BUDGET = 24 * 1024 * 1024   # conservative: fits v7x (64 MiB physical) easily


def _make_dann_kernel(nk):
    """Build the kernel specialized on the static number of K reduction steps."""

    def kernel(x_ref, w_ref, b_ref, o_ref):
        # Partial product on the MXU, f32 accumulation.
        acc = jnp.dot(x_ref[...], w_ref[...], preferred_element_type=jnp.float32)

        if nk == 1:
            # Fully fused: matmul + bias + ReLU in a single store, no init pass.
            o_ref[...] = jnp.maximum(acc + b_ref[...], 0.0)
        else:
            k = pl.program_id(2)

            @pl.when(k == 0)
            def _():
                o_ref[...] = acc                       # first write, no zero-fill

            @pl.when(jnp.logical_and(k > 0, k < nk - 1))
            def _():
                o_ref[...] += acc

            @pl.when(k == nk - 1)
            def _():
                # Fused final accumulate + bias + ReLU epilogue (f32).
                o_ref[...] = jnp.maximum(o_ref[...] + acc + b_ref[...], 0.0)

    return kernel


def prepare_params(weight, bias):
    """One-time parameter preparation (call OUTSIDE the per-step forward).

    weight: (n_hidden, n_input) float32  -- PyTorch Linear layout
    bias:   (n_hidden,)         float32
    Returns:
      wt: (Kp, Hp) bfloat16 -- transposed, K and n_hidden zero-padded to
                               multiples of 128 (lane-dense, MXU-native dtype)
      b2: (1,  Hp) float32  -- bias kept in f32 for the epilogue
    """
    n_hidden, n_input = weight.shape
    Hp = _round_up(n_hidden, 128)
    Kp = _round_up(n_input, 128)
    wt = (jnp.zeros((Kp, Hp), jnp.bfloat16)
          .at[:n_input, :n_hidden].set(weight.T.astype(jnp.bfloat16)))
    b2 = (jnp.zeros((1, Hp), jnp.float32)
          .at[0, :n_hidden].set(bias.astype(jnp.float32)))
    return wt, b2


@functools.partial(jax.jit, static_argnames=("n_hidden", "tm", "tn", "tk"))
def dann_backbone_forward(x, wt, b2, *, n_hidden, tm=128, tn=512, tk=1024):
    """Pallas forward of DaNNBackbone (eval-mode dropout = identity).

    Args:
      x:        (B, C, H, W) float32  (NCHW; flattened inside == torch .view)
      wt, b2:   outputs of prepare_params (bf16 transposed weight, f32 bias)
      n_hidden: true output feature dim (lane padding is sliced off)
      tm/tn/tk: tile caps (batch / n_hidden / reduction); actual tiles are
                chosen as divisors of the padded dims within a VMEM budget.
    Returns:
      (B, n_hidden) float32
    """
    B = x.shape[0]
    xf = x.reshape(B, -1)              # row-major flatten == torch.view
    K = xf.shape[1]
    Kp, Hp = wt.shape
    assert K <= Kp, "x feature dim larger than prepared weight"

    # --- batch tile: >= 2 M tiles when B > 8 so both v7x TCs get work ---
    if B <= 8:
        tm_eff = 8
    elif B <= tm:
        tm_eff = _round_up(-(-B // 2), 8)
    else:
        tm_eff = tm
    Bp = _round_up(B, tm_eff)

    # --- N / K tiles: largest 128-multiples dividing the padded dims, then
    #     shrink K tile until the double-buffered footprint fits the budget ---
    tn_eff = _pick_tile(Hp, tn, 128)
    tk_eff = _pick_tile(Kp, tk, 128)
    while tk_eff > 128 and _vmem_tile_bytes(tm_eff, tk_eff, tn_eff) > _VMEM_BUDGET:
        tk_eff = _pick_tile(Kp, tk_eff // 2, 128)

    # --- bf16 activations, single merged pad (batch + K); zeros are inert ---
    xf = xf.astype(jnp.bfloat16)
    if Bp != B or Kp != K:
        xf = jnp.pad(xf, ((0, Bp - B), (0, Kp - K)))

    grid = (Bp // tm_eff, Hp // tn_eff, Kp // tk_eff)
    kernel = _make_dann_kernel(grid[2])

    out = pl.pallas_call(
        kernel,
        out_shape=jax.ShapeDtypeStruct((Bp, Hp), jnp.float32),
        grid_spec=pltpu.PrefetchScalarGridSpec(
            num_scalar_prefetch=0,
            grid=grid,
            in_specs=[
                pl.BlockSpec((tm_eff, tk_eff), lambda i, j, k: (i, k)),   # x
                pl.BlockSpec((tk_eff, tn_eff), lambda i, j, k: (k, j)),   # W^T
                pl.BlockSpec((1, tn_eff), lambda i, j, k: (0, j)),        # bias
            ],
            # Output block constant across k -> VMEM-resident f32 accumulator.
            out_specs=pl.BlockSpec((tm_eff, tn_eff), lambda i, j, k: (i, j)),
        ),
        compiler_params=pltpu.CompilerParams(
            dimension_semantics=("parallel", "parallel", "arbitrary"),
            vmem_limit_bytes=32 * 1024 * 1024,
        ),
    )(xf, wt, b2)

    # Note: downstream consumers that tolerate the lane-dense (Bp, Hp) slab
    # should take `out` directly; this slice exists only to match the module.
    return out[:B, :n_hidden]


if __name__ == "__main__":
    # Small shapes consistent with the module: n_input = C*H*W = 4*16*16 = 1024
    B, C, H, W = 2, 4, 16, 16
    n_input = C * H * W
    n_hidden = 32

    key = jax.random.PRNGKey(0)
    kx, kw, kb = jax.random.split(key, 3)

    x = jax.random.normal(kx, (B, C, H, W), dtype=jnp.float32)

    # Deterministic init mimicking nn.Linear default: U(-1/sqrt(fan_in), 1/sqrt(fan_in))
    bound = 1.0 / (n_input ** 0.5)
    weight = jax.random.uniform(
        kw, (n_hidden, n_input), minval=-bound, maxval=bound, dtype=jnp.float32
    )
    bias = jax.random.uniform(
        kb, (n_hidden,), minval=-bound, maxval=bound, dtype=jnp.float32
    )

    # One-time parameter prep (transpose + lane padding + bf16), outside the fwd.
    wt, b2 = prepare_params(weight, bias)

    out = dann_backbone_forward(x, wt, b2, n_hidden=n_hidden)
    out = jax.block_until_ready(out)

    # Reference with matching numerics: bf16 inputs, f32 accumulation, f32 epilogue.
    xf = x.reshape(B, -1)
    ref_bf16 = jnp.maximum(
        jnp.dot(xf.astype(jnp.bfloat16), weight.T.astype(jnp.bfloat16),
                preferred_element_type=jnp.float32) + bias, 0.0)
    # Full-f32 reference (eval-mode dropout = identity), looser tolerance.
    ref_f32 = jnp.maximum(xf @ weight.T + bias, 0.0)

    assert out.shape == (B, n_hidden)
    assert jnp.allclose(out, ref_bf16, atol=1e-2, rtol=1e-2), "mismatch vs bf16 reference"
    assert jnp.allclose(out, ref_f32, atol=5e-2, rtol=5e-2), "mismatch vs f32 reference"

    print("KERNEL_OK")
</pallas_src>

<mosaic_0001>
module attributes {stable_mosaic.version = 11 : i64} {
  func.func @kernel(%arg0: i32, %arg1: i32, %arg2: i32, %arg3: memref<8x1024xbf16, #tpu.memory_space<vmem>>, %arg4: memref<1024x128xbf16, #tpu.memory_space<vmem>>, %arg5: memref<1x128xf32, #tpu.memory_space<vmem>>, %arg6: memref<8x128xf32, #tpu.memory_space<vmem>>) attributes {dimension_semantics = [#tpu.dimension_semantics<parallel>, #tpu.dimension_semantics<parallel>, #tpu.dimension_semantics<arbitrary>], iteration_bounds = array<i64: 1, 1, 1>, scalar_prefetch = 0 : i64, scratch_operands = 0 : i64, tpu.core_type = #tpu.core_type<tc>, window_params = [{transform_indices = @transform_0, window_bounds = array<i64: 8, 1024>}, {transform_indices = @transform_1, window_bounds = array<i64: 1024, 128>}, {transform_indices = @transform_2, window_bounds = array<i64: 1, 128>}, {transform_indices = @transform_3, window_bounds = array<i64: 8, 128>}]} {
    %c0 = arith.constant 0 : index
    %c0_0 = arith.constant 0 : index
    %0 = vector.load %arg3[%c0, %c0_0] : memref<8x1024xbf16, #tpu.memory_space<vmem>>, vector<8x1024xbf16>
    %c0_1 = arith.constant 0 : index
    %c0_2 = arith.constant 0 : index
    %1 = vector.load %arg4[%c0_1, %c0_2] : memref<1024x128xbf16, #tpu.memory_space<vmem>>, vector<1024x128xbf16>
    %cst = arith.constant dense<0.000000e+00> : vector<8x128xf32>
    %2 = tpu.matmul %0, %1, %cst {dimension_numbers = #tpu.dot_dimension_numbers<[1], [0], [0], [1], [0, 0, 1, 1], [], []>} : vector<8x1024xbf16>, vector<1024x128xbf16>, vector<8x128xf32> -> vector<8x128xf32>
    %c0_3 = arith.constant 0 : index
    %c0_4 = arith.constant 0 : index
    %3 = vector.load %arg5[%c0_3, %c0_4] : memref<1x128xf32, #tpu.memory_space<vmem>>, vector<1x128xf32>
    %4 = vector.broadcast %3 : vector<1x128xf32> to vector<8x128xf32>
    %5 = arith.addf %2, %4 : vector<8x128xf32>
    %cst_5 = arith.constant 0.000000e+00 : f32
    %6 = vector.broadcast %cst_5 : f32 to vector<8x128xf32>
    %7 = arith.maximumf %5, %6 : vector<8x128xf32>
    %c0_6 = arith.constant 0 : index
    %c0_7 = arith.constant 0 : index
    %8 = vector.load %arg6[%c0_6, %c0_7] : memref<8x128xf32, #tpu.memory_space<vmem>>, vector<8x128xf32>
    tpu.vector_store %arg6[%c0_6, %c0_7], %7 {strides = array<i32>} : memref<8x128xf32, #tpu.memory_space<vmem>>, vector<8x128xf32>,
    return
  }
  func.func @transform_0(%arg0: i32, %arg1: i32, %arg2: i32) -> (i32, i32) {
    %c0_i32 = arith.constant 0 : i32
    return %arg0, %arg2 : i32, i32
  }
  func.func @transform_1(%arg0: i32, %arg1: i32, %arg2: i32) -> (i32, i32) {
    %c0_i32 = arith.constant 0 : i32
    return %arg2, %arg1 : i32, i32
  }
  func.func @transform_2(%arg0: i32, %arg1: i32, %arg2: i32) -> (i32, i32) {
    %c0_i32 = arith.constant 0 : i32
    %c0_i32_0 = arith.constant 0 : i32
    return %c0_i32, %arg1 : i32, i32
  }
  func.func @transform_3(%arg0: i32, %arg1: i32, %arg2: i32) -> (i32, i32) {
    %c0_i32 = arith.constant 0 : i32
    return %arg0, %arg1 : i32, i32
  }
}

</mosaic_0001>

<bundles_post_ra>
// kernel: dann_backbone_forward.1
= control target key start
LH: loop header
LB: loop body
LE: loop exit
PB: predicated region body
PF: predicated region fallthrough
CT: control target
= control target key end

     0   :  { %8 = vsyncpa [#allocation3], 0  ;;  %s1039_s15 = smov [#allocation2]   ;;  %s1040_s17 = smov 64   ;;  %s1083_s0 = inlined_call_operand.vmem [shape: bf16[8,1024], index: 0, kind: input, shape index: {}]   ;;  %s1084_s1 = inlined_call_operand.hbm [shape: bf16[1024,128], index: 1, kind: input, shape index: {}]   ;;  %s1085_s2 = inlined_call_operand.vmem [shape: f32[1,128], index: 2, kind: input, shape index: {}]   ;;  %s1086_s3 = inlined_call_operand.vmem [shape: f32[8,128], index: 3, kind: output, shape index: {}]  }
   0x1   :  { %s15_s14 = sshll.u32 %s1084_s1, 4  ;;  %s17_s16 = sshll.u32 %s1039_s15, 4  ;;  %s16_s14 = int_to_ptr.hbm [resolvable:$true] %s15_s14  ;;  %s18_s16 = int_to_ptr.vmem [resolvable:$true] %s17_s16 }
   0x2   :  { %s1041_s18 = smov 4  }
   0x3   :  { %23 = dma.hbm_to_vmem [thread:$0]  %s16_s14, 8192, %s18_s16, [#allocation3], %s1040_s17, %s1040_s17, %s1041_s18  }
   0x4   :  { %1037 = dma.done.wait [#allocation3], 8192  }
   0x5   :  { %1038 = vsyncadd [#allocation3], 4294959104  ;;  %v952_v0 = vld [vmem:[#allocation2 + $0x38] sm:$0xff]  ;;  %v951_v4 = vld [vmem:[#allocation2 + $0x30] sm:$0xff] }
   0x6   :  { %v960_v1 = vld [vmem:[#allocation2 + $0x78] sm:$0xff]  ;;  %578 = vmatpush.bf16.msra.mxu0 %v952_v0  ;;  %v959_v5 = vld [vmem:[#allocation2 + $0x70] sm:$0xff]  ;;  %v950_v8 = vld [vmem:[#allocation2 + $0x28] sm:$0xff] }
   0x7   :  { %v968_v2 = vld [vmem:[#allocation2 + $0xb8] sm:$0xff]  ;;  %591 = vmatpush.bf16.msra.mxu1 %v960_v1  ;;  %v967_v6 = vld [vmem:[#allocation2 + $0xb0] sm:$0xff]  ;;  %v958_v9 = vld [vmem:[#allocation2 + $0x68] sm:$0xff] }
   0x8   :  { %v976_v3 = vld [vmem:[#allocation2 + $0xf8] sm:$0xff]  ;;  %604 = vmatpush.bf16.msra.mxu2 %v968_v2  ;;  %v975_v7 = vld [vmem:[#allocation2 + $0xf0] sm:$0xff]  ;;  %v966_v10 = vld [vmem:[#allocation2 + $0xa8] sm:$0xff] }
   0x9   :  { %617 = vmatpush.bf16.msra.mxu3 %v976_v3  ;;  %v974_v11 = vld [vmem:[#allocation2 + $0xe8] sm:$0xff]  ;;  %v949_v12 = vld [vmem:[#allocation2 + $0x20] sm:$0xff]  ;;  %v948_v16 = vld [vmem:[#allocation2 + $0x18] sm:$0xff] }
   0xa   :  { %579 = vmatpush.bf16.msra.mxu0 %v951_v4  ;;  %v957_v13 = vld [vmem:[#allocation2 + $0x60] sm:$0xff]  ;;  %v956_v17 = vld [vmem:[#allocation2 + $0x58] sm:$0xff]  ;;  %v947_v20 = vld [vmem:[#allocation2 + $0x10] sm:$0xff] }
   0xb   :  { %592 = vmatpush.bf16.msra.mxu1 %v959_v5  ;;  %v965_v14 = vld [vmem:[#allocation2 + $0xa0] sm:$0xff]  ;;  %v964_v18 = vld [vmem:[#allocation2 + $0x98] sm:$0xff]  ;;  %v955_v21 = vld [vmem:[#allocation2 + $0x50] sm:$0xff] }
   0xc   :  { %605 = vmatpush.bf16.msra.mxu2 %v967_v6  ;;  %v973_v15 = vld [vmem:[#allocation2 + $0xe0] sm:$0xff]  ;;  %v972_v19 = vld [vmem:[#allocation2 + $0xd8] sm:$0xff]  ;;  %v963_v22 = vld [vmem:[#allocation2 + $0x90] sm:$0xff] }
   0xd   :  { %618 = vmatpush.bf16.msra.mxu3 %v975_v7  ;;  %v971_v23 = vld [vmem:[#allocation2 + $0xd0] sm:$0xff]  ;;  %v946_v24 = vld [vmem:[#allocation2 + $0x8] sm:$0xff]  ;;  %v30_v29 = vld [vmem:[%s1083_s0] sm:$0xff] }
   0xe   :  { %580 = vmatpush.bf16.msra.mxu0 %v950_v8  ;;  %v954_v25 = vld [vmem:[#allocation2 + $0x48] sm:$0xff]  ;;  %v945_v30 = vld [vmem:[#allocation2] sm:$0xff]  ;;  %v170_v36 = vunpack.c.l.b16 %v30_v29  ;;  %v171_v37 = vunpack.c.h.b16 %v30_v29  ;;  %v984_v38 = vld [vmem:[#allocation2 + $0x138] sm:$0xff] }
   0xf   :  { %593 = vmatpush.bf16.msra.mxu1 %v958_v9  ;;  %v962_v26 = vld [vmem:[#allocation2 + $0x88] sm:$0xff]  ;;  %v953_v31 = vld [vmem:[#allocation2 + $0x40] sm:$0xff]  ;;  %v992_v39 = vld [vmem:[#allocation2 + $0x178] sm:$0xff] }
  0x10   :  { %606 = vmatpush.bf16.msra.mxu2 %v966_v10  ;;  %v970_v27 = vld [vmem:[#allocation2 + $0xc8] sm:$0xff]  ;;  %v961_v34 = vld [vmem:[#allocation2 + $0x80] sm:$0xff]  ;;  %v1000_v40 = vld [vmem:[#allocation2 + $0x1b8] sm:$0xff]  ;;  %v178_v44 = vpack.c.b16 %v170_v36, %v170_v36  ;;  %v179_v45 = vpack.c.b16 %v171_v37, %v171_v37 }
  0x11   :  { %619 = vmatpush.bf16.msra.mxu3 %v974_v11  ;;  %v31_v28 = vld [vmem:[%s1083_s0 + $0x8] sm:$0xff]  ;;  %v969_v35 = vld [vmem:[#allocation2 + $0xc0] sm:$0xff]  ;;  %v1008_v41 = vld [vmem:[#allocation2 + $0x1f8] sm:$0xff] }
  0x12   :  { %581 = vmatpush.bf16.msra.mxu0 %v949_v12  ;;  %v172_v32 = vunpack.c.l.b16 %v31_v28  ;;  %v173_v33 = vunpack.c.h.b16 %v31_v28  ;;  %v983_v46 = vld [vmem:[#allocation2 + $0x130] sm:$0xff]  ;;  %v982_v50 = vld [vmem:[#allocation2 + $0x128] sm:$0xff]  ;;  %v981_v54 = vld [vmem:[#allocation2 + $0x120] sm:$0xff] }
  0x13   :  { %594 = vmatpush.bf16.msra.mxu1 %v957_v13  ;;  %v991_v47 = vld [vmem:[#allocation2 + $0x170] sm:$0xff]  ;;  %v990_v51 = vld [vmem:[#allocation2 + $0x168] sm:$0xff]  ;;  %v989_v55 = vld [vmem:[#allocation2 + $0x160] sm:$0xff] }
  0x14   :  { %607 = vmatpush.bf16.msra.mxu2 %v965_v14  ;;  %v180_v42 = vpack.c.b16 %v172_v32, %v172_v32  ;;  %v181_v43 = vpack.c.b16 %v173_v33, %v173_v33  ;;  %v999_v48 = vld [vmem:[#allocation2 + $0x1b0] sm:$0xff]  ;;  %v998_v52 = vld [vmem:[#allocation2 + $0x1a8] sm:$0xff]  ;;  %v997_v56 = vld [vmem:[#allocation2 + $0x1a0] sm:$0xff] }
  0x15   :  { %620 = vmatpush.bf16.msra.mxu3 %v973_v15  ;;  %v1007_v49 = vld [vmem:[#allocation2 + $0x1f0] sm:$0xff]  ;;  %v1006_v53 = vld [vmem:[#allocation2 + $0x1e8] sm:$0xff]  ;;  %v1005_v57 = vld [vmem:[#allocation2 + $0x1e0] sm:$0xff] }
  0x16   :  { %582 = vmatpush.bf16.msra.mxu0 %v948_v16  ;;  %v980_v58 = vld [vmem:[#allocation2 + $0x118] sm:$0xff]  ;;  %v979_v62 = vld [vmem:[#allocation2 + $0x110] sm:$0xff]  ;;  %v978_v2 = vld [vmem:[#allocation2 + $0x108] sm:$0xff] }
  0x17   :  { %595 = vmatpush.bf16.msra.mxu1 %v956_v17  ;;  %v988_v59 = vld [vmem:[#allocation2 + $0x158] sm:$0xff]  ;;  %v987_v63 = vld [vmem:[#allocation2 + $0x150] sm:$0xff]  ;;  %v986_v3 = vld [vmem:[#allocation2 + $0x148] sm:$0xff] }
  0x18   :  { %608 = vmatpush.bf16.msra.mxu2 %v964_v18  ;;  %v996_v60 = vld [vmem:[#allocation2 + $0x198] sm:$0xff]  ;;  %v995_v0 = vld [vmem:[#allocation2 + $0x190] sm:$0xff]  ;;  %v994_v5 = vld [vmem:[#allocation2 + $0x188] sm:$0xff] }
  0x19   :  { %621 = vmatpush.bf16.msra.mxu3 %v972_v19  ;;  %v1004_v61 = vld [vmem:[#allocation2 + $0x1d8] sm:$0xff]  ;;  %v1003_v1 = vld [vmem:[#allocation2 + $0x1d0] sm:$0xff]  ;;  %v1002_v6 = vld [vmem:[#allocation2 + $0x1c8] sm:$0xff] }
  0x1a   :  { %583 = vmatpush.bf16.msra.mxu0 %v947_v20  ;;  %v32_v4 = vld [vmem:[%s1083_s0 + $0x10] sm:$0xff]  ;;  %v33_v7 = vld [vmem:[%s1083_s0 + $0x18] sm:$0xff]  ;;  %v977_v10 = vld [vmem:[#allocation2 + $0x100] sm:$0xff] }
  0x1b   :  { %596 = vmatpush.bf16.msra.mxu1 %v955_v21  ;;  %v174_v8 = vunpack.c.l.b16 %v32_v4  ;;  %v175_v9 = vunpack.c.h.b16 %v32_v4  ;;  %v985_v11 = vld [vmem:[#allocation2 + $0x140] sm:$0xff]  ;;  %v176_v12 = vunpack.c.l.b16 %v33_v7  ;;  %v177_v13 = vunpack.c.h.b16 %v33_v7 }
  0x1c   :  { %609 = vmatpush.bf16.msra.mxu2 %v963_v22  ;;  %v993_v14 = vld [vmem:[#allocation2 + $0x180] sm:$0xff] }
  0x1d   :  { %622 = vmatpush.bf16.msra.mxu3 %v971_v23  ;;  %v1001_v15 = vld [vmem:[#allocation2 + $0x1c0] sm:$0xff]  ;;  %v182_v16 = vpack.c.b16 %v174_v8, %v174_v8  ;;  %v183_v17 = vpack.c.b16 %v175_v9, %v175_v9  ;;  %v184_v18 = vpack.c.b16 %v176_v12, %v176_v12  ;;  %v185_v19 = vpack.c.b16 %v177_v13, %v177_v13 }
  0x1e   :  { %584 = vmatpush.bf16.msra.mxu0 %v946_v24 }
  0x1f   :  { %597 = vmatpush.bf16.msra.mxu1 %v954_v25 }
  0x20   :  { %610 = vmatpush.bf16.msra.mxu2 %v962_v26  ;;  %v1012_v26 = vld [vmem:[%s1085_s2] ss:$0 sm:$0xff] }
  0x21   :  { %623 = vmatpush.bf16.msra.mxu3 %v970_v27 }
  0x22   :  { %585 = vmatpush.bf16.msra.mxu0 %v945_v30 }
  0x23   :  { %598 = vmatpush.bf16.msra.mxu1 %v953_v31 }
  0x24   :  { %611 = vmatpush.bf16.msra.mxu2 %v961_v34 }
  0x25   :  { %624 = vmatpush.bf16.msra.mxu3 %v969_v35  ;;  %586 = vmatmul.bf16.vlgmr.msra.gmra.mxu0 %v178_v44 }
  0x26   :  { %630 = vmatpush.bf16.msrb.mxu0 %v984_v38  ;;  %599 = vmatmul.bf16.vlgmr.msra.gmra.mxu1 %v179_v45 }
  0x27   :  { %643 = vmatpush.bf16.msrb.mxu1 %v992_v39  ;;  %612 = vmatmul.bf16.vlgmr.msra.gmra.mxu2 %v180_v42 }
  0x28   :  { %656 = vmatpush.bf16.msrb.mxu2 %v1000_v40  ;;  %625 = vmatmul.bf16.vlgmr.msra.gmra.mxu3 %v181_v43 }
  0x29   :  { %669 = vmatpush.bf16.msrb.mxu3 %v1008_v41 }
  0x2a   :  { %631 = vmatpush.bf16.msrb.mxu0 %v983_v46 }
  0x2b   :  { %644 = vmatpush.bf16.msrb.mxu1 %v991_v47 }
  0x2c   :  { %657 = vmatpush.bf16.msrb.mxu2 %v999_v48 }
  0x2d   :  { %670 = vmatpush.bf16.msrb.mxu3 %v1007_v49 }
  0x2e   :  { %632 = vmatpush.bf16.msrb.mxu0 %v982_v50 }
  0x2f   :  { %645 = vmatpush.bf16.msrb.mxu1 %v990_v51 }
  0x30   :  { %658 = vmatpush.bf16.msrb.mxu2 %v998_v52 }
  0x31   :  { %671 = vmatpush.bf16.msrb.mxu3 %v1006_v53 }
  0x32   :  { %633 = vmatpush.bf16.msrb.mxu0 %v981_v54 }
  0x33   :  { %646 = vmatpush.bf16.msrb.mxu1 %v989_v55 }
  0x34   :  { %659 = vmatpush.bf16.msrb.mxu2 %v997_v56 }
  0x35   :  { %672 = vmatpush.bf16.msrb.mxu3 %v1005_v57 }
  0x36   :  { %634 = vmatpush.bf16.msrb.mxu0 %v980_v58 }
  0x37   :  { %647 = vmatpush.bf16.msrb.mxu1 %v988_v59 }
  0x38   :  { %660 = vmatpush.bf16.msrb.mxu2 %v996_v60 }
  0x39   :  { %673 = vmatpush.bf16.msrb.mxu3 %v1004_v61 }
  0x3a   :  { %635 = vmatpush.bf16.msrb.mxu0 %v979_v62 }
  0x3b   :  { %648 = vmatpush.bf16.msrb.mxu1 %v987_v63 }
  0x3c   :  { %661 = vmatpush.bf16.msrb.mxu2 %v995_v0 }
  0x3d   :  { %674 = vmatpush.bf16.msrb.mxu3 %v1003_v1 }
  0x3e   :  { %636 = vmatpush.bf16.msrb.mxu0 %v978_v2 }
  0x3f   :  { %649 = vmatpush.bf16.msrb.mxu1 %v986_v3 }
  0x40   :  { %662 = vmatpush.bf16.msrb.mxu2 %v994_v5 }
  0x41   :  { %675 = vmatpush.bf16.msrb.mxu3 %v1002_v6 }
  0x42   :  { %637 = vmatpush.bf16.msrb.mxu0 %v977_v10 }
  0x43   :  { %650 = vmatpush.bf16.msrb.mxu1 %v985_v11 }
  0x44   :  { %663 = vmatpush.bf16.msrb.mxu2 %v993_v14 }
  0x45   :  { %676 = vmatpush.bf16.msrb.mxu3 %v1001_v15  ;;  %638 = vmatmul.bf16.vlgmr.msrb.gmra.mxu0 %v182_v16 }
  0x46   :  { %651 = vmatmul.bf16.vlgmr.msrb.gmra.mxu1 %v183_v17 }
  0x47   :  { %664 = vmatmul.bf16.vlgmr.msrb.gmra.mxu2 %v184_v18 }
  0x48   :  { %677 = vmatmul.bf16.vlgmr.msrb.gmra.mxu3 %v185_v19 }
  0xa2   :  { %v587_v20 = vpop.f32.mrf.mxu0 }
  0xa3   :  { %v600_v21 = vpop.f32.mrf.mxu1  ;;  %v588_v29 = vadd.f32 %v1012_v26, %v587_v20 }
  0xa5   :  { %v601_v30 = vadd.f32 %v600_v21, %v588_v29 }
  0xaa   :  { %v613_v22 = vpop.f32.mrf.mxu2  ;;  %v589_v24 = vpop.f32.mrf.mxu0 }
  0xab   :  { %v626_v23 = vpop.f32.mrf.mxu3  ;;  %v602_v25 = vpop.f32.mrf.mxu1  ;;  %v614_v31 = vadd.f32 %v613_v22, %v601_v30 }
  0xad   :  { %v627_v32 = vadd.f32 %v626_v23, %v614_v31 }
  0xb2   :  { %v615_v27 = vpop.f32.mrf.mxu2 }
  0xb3   :  { %v628_v28 = vpop.f32.mrf.mxu3 }
  0xc2   :  { %v639_v33 = vpop.f32.mrf.mxu0 }
  0xc3   :  { %v652_v34 = vpop.f32.mrf.mxu1  ;;  %v640_v35 = vadd.f32 %v639_v33, %v627_v32 }
  0xc5   :  { %v653_v36 = vadd.f32 %v652_v34, %v640_v35 }
  0xca   :  { %v665_v37 = vpop.f32.mrf.mxu2  ;;  %v641_v40 = vpop.f32.mrf.mxu0 }
  0xcb   :  { %v678_v38 = vpop.f32.mrf.mxu3  ;;  %v666_v39 = vadd.f32 %v665_v37, %v653_v36  ;;  %v654_v41 = vpop.f32.mrf.mxu1 }
  0xcd   :  { %v679_v42 = vadd.f32 %v678_v38, %v666_v39 }
  0xcf   :  { %v682_v43 = vmax.f32 %v679_v42, 0.0 }
  0xd1   :  { %683 = vst [vmem:[%s1086_s3] sm:$0xff] %v682_v43 }
  0xd2   :  { %v667_v44 = vpop.f32.mrf.mxu2 }
  0xd3   :  { %v680_v45 = vpop.f32.mrf.mxu3 }
  0xd4   :  { %688 = vsyncpa [#allocation3], 1 }

</bundles_post_ra>
